<compile_context>
chip_gen: v7x
topology: tpu7x:2x2x1
jax: 0.10.0
libtpu: 0.0.40
codegen_flags: <defaults>
</compile_context>

<pallas_src>
import functools

import jax
import jax.numpy as jnp
from jax.experimental import pallas as pl
from jax.experimental.pallas import tpu as pltpu


def _round_up(x, m):
    return (x + m - 1) // m * m


def _gelu_exact(x):
    # PyTorch nn.GELU() default: exact erf formulation (f32 parity path).
    return 0.5 * x * (1.0 + jax.lax.erf(x * (2.0 ** -0.5)))


_SQRT_2_OVER_PI = 0.7978845608028654


def _gelu_tanh(x):
    # tanh approximation: transcendental goes to the EUP slot (otherwise idle)
    # instead of a long VALU erf polynomial over the (tm, 4*D) intermediate.
    return 0.5 * x * (1.0 + jnp.tanh(_SQRT_2_OVER_PI * (x + 0.044715 * (x * x * x))))


def _mlp_kernel(x_ref, w1_ref, b1_ref, w2_ref, b2_ref, o_ref, *,
                h_chunk, approximate):
    gelu = _gelu_tanh if approximate else _gelu_exact

    x = x_ref[...]                                     # (tm, D_pad), native dtype
    h_total = w1_ref.shape[1]
    n_chunks = h_total // h_chunk

    # f32 accumulator for the second matmul; hidden dim processed in static
    # slabs so the (tm, h_chunk) f32 intermediate stays small in VMEM and the
    # GELU (VALU/EUP) of one slab overlaps the MXU work of the next.
    y = jnp.zeros((x.shape[0], o_ref.shape[1]), jnp.float32)
    for c in range(n_chunks):                          # static, unrolled; ref views are free
        lo = c * h_chunk
        h = jnp.dot(x, w1_ref[:, lo:lo + h_chunk],
                    preferred_element_type=jnp.float32)
        h = gelu(h + b1_ref[:, lo:lo + h_chunk])       # f32 epilogue
        # Cast back to the weight dtype so bf16 weights keep the full-rate MXU
        # path; accumulate in f32 via preferred_element_type.
        y = y + jnp.dot(h.astype(w2_ref.dtype), w2_ref[lo:lo + h_chunk, :],
                        preferred_element_type=jnp.float32)

    y = y + b2_ref[...]
    o_ref[...] = gelu(y).astype(o_ref.dtype)


def _choose_tm(M, *, tm_max=512, sublane=8):
    """Row tile minimizing padding waste, sublane-aligned, and yielding >= 2
    grid steps whenever the row count permits (v7x megacore sharding)."""
    M_sub = _round_up(max(M, 1), sublane)
    if M_sub <= 64:
        half = _round_up(max(M_sub // 2, sublane), sublane)
        cands = {sublane, half, M_sub}
    else:
        cands = {c for c in (512, 256, 128, 64) if c <= tm_max}
        if not cands:
            cands = {64}
    want_multi = M_sub >= 2 * sublane
    best_key, best = None, None
    for c in sorted(cands):
        steps = -(-M // c)
        m_pad = steps * c
        waste = m_pad - M
        penalty = 1 if (want_multi and steps < 2) else 0
        key = (penalty, waste, -c)
        if best_key is None or key < best_key:
            best_key, best = key, (c, m_pad)
    return best


def _choose_h_chunk(H_pad, tm, budget_bytes=2 * 1024 * 1024):
    """Largest multiple of 128 dividing H_pad whose f32 (tm, chunk) slab fits
    the per-tile intermediate budget."""
    if H_pad * tm * 4 <= budget_bytes:
        return H_pad
    best = 128
    for c in range(128, H_pad + 1, 128):
        if H_pad % c == 0 and c * tm * 4 <= budget_bytes:
            best = c
    return best


def _vmem_limit_bytes():
    """Generation-aware VMEM limit: ~85% of physical capacity (leaves headroom
    for Mosaic internal scratch).  ~54 MiB on v7x, ~108 MiB on v5e/v6e."""
    try:
        cap = int(pltpu.get_tpu_info().vmem_capacity_bytes)
    except Exception:
        cap = 64 * 1024 * 1024
    if cap <= 0:
        cap = 64 * 1024 * 1024
    return max(32 * 1024 * 1024, int(cap * 0.85))


def prepare_mlp_params(w1, b1, w2, b2, *, compute_dtype=jnp.bfloat16):
    """One-time (init-time) padding + cast of the projector weights.

    Hoisted out of the per-call path so the padded/cast weights are streamed
    straight from HBM on every call (no per-call pad/cast HBM traffic).

    w1: [D, H]   (transposed vs. PyTorch nn.Linear's [out, in]),  b1: [H] or [1, H]
    w2: [H, D],  b2: [D] or [1, D]
    compute_dtype: matmul-input dtype.  bf16 (default) is recommended on
    v5e/v6e/v7x (bf16-native MXU, half the resident-weight VMEM); pass
    jnp.float32 (or None) for exact parity with the PyTorch f32 module.
    """
    D, H = w1.shape
    D_pad = _round_up(D, 128)
    H_pad = _round_up(H, 128)
    wd = w1.dtype if compute_dtype is None else compute_dtype
    b1 = jnp.asarray(b1, jnp.float32).reshape(1, -1)
    b2 = jnp.asarray(b2, jnp.float32).reshape(1, -1)
    w1p = jnp.pad(w1.astype(wd), ((0, D_pad - D), (0, H_pad - H)))
    b1p = jnp.pad(b1, ((0, 0), (0, H_pad - H)))
    w2p = jnp.pad(w2.astype(wd), ((0, H_pad - H), (0, D_pad - D)))
    b2p = jnp.pad(b2, ((0, 0), (0, D_pad - D)))
    return w1p, b1p, w2p, b2p


@functools.partial(jax.jit, static_argnames=("tm_max", "approximate_gelu"))
def audio_projector_mlp(x, w1p, b1p, w2p, b2p, *, tm_max=512,
                        approximate_gelu=None):
    """Fused MLP: gelu(gelu(x @ w1 + b1) @ w2 + b2).

    x:   [B, T, D]
    w1p/b1p/w2p/b2p: padded params from prepare_mlp_params().
    approximate_gelu: None -> tanh-approx GELU iff weights are sub-32-bit
    (bf16 path); False -> exact erf (PyTorch parity).
    Returns [B, T, D] in x's original dtype.
    """
    B, T, D = x.shape
    D_pad, H_pad = w1p.shape
    out_dtype = x.dtype
    compute_dtype = w1p.dtype
    itemsize = jnp.dtype(compute_dtype).itemsize
    if approximate_gelu is None:
        approximate_gelu = itemsize < 4

    M = B * T
    sublane = 16 if itemsize == 2 else 8
    tm, M_pad = _choose_tm(M, tm_max=tm_max, sublane=sublane)
    h_chunk = _choose_h_chunk(H_pad, tm)

    # Per-call work: only x is padded/cast (x varies per call; weights were
    # prepared once at init).  Feature dims are already lane-dense (x128).
    x2 = jnp.pad(x.reshape(M, D).astype(compute_dtype),
                 ((0, M_pad - M), (0, D_pad - D)))

    grid = (M_pad // tm,)
    kernel = functools.partial(_mlp_kernel, h_chunk=h_chunk,
                               approximate=bool(approximate_gelu))

    bytes_accessed = (
        x2.size * x2.dtype.itemsize
        + M_pad * D_pad * jnp.dtype(out_dtype).itemsize
        + w1p.size * w1p.dtype.itemsize + w2p.size * w2p.dtype.itemsize
        + b1p.size * b1p.dtype.itemsize + b2p.size * b2p.dtype.itemsize)
    cost = pl.CostEstimate(
        flops=4 * M_pad * D_pad * H_pad,            # two matmuls, MAC = 2 flops
        transcendentals=M_pad * (H_pad + D_pad),    # two GELUs
        bytes_accessed=int(bytes_accessed))

    out = pl.pallas_call(
        kernel,
        out_shape=jax.ShapeDtypeStruct((M_pad, D_pad), out_dtype),
        grid=grid,
        in_specs=[
            pl.BlockSpec((tm, D_pad), lambda i: (i, 0)),            # x rows (pipelined)
            # Grid-invariant operands: single-buffered (no wasted VMEM copy).
            pl.BlockSpec((D_pad, H_pad), lambda i: (0, 0),
                         pipeline_mode=pl.Buffered(1)),             # w1 (resident)
            pl.BlockSpec((1, H_pad), lambda i: (0, 0),
                         pipeline_mode=pl.Buffered(1)),             # b1
            pl.BlockSpec((H_pad, D_pad), lambda i: (0, 0),
                         pipeline_mode=pl.Buffered(1)),             # w2 (resident)
            pl.BlockSpec((1, D_pad), lambda i: (0, 0),
                         pipeline_mode=pl.Buffered(1)),             # b2
        ],
        out_specs=pl.BlockSpec((tm, D_pad), lambda i: (i, 0)),
        compiler_params=pltpu.CompilerParams(
            dimension_semantics=("parallel",),
            vmem_limit_bytes=_vmem_limit_bytes()),
        cost_estimate=cost,
    )(x2, w1p, b1p, w2p, b2p)

    # Strip row / lane padding.
    return out[:M, :D].reshape(B, T, D)


def init_mlp_params(key, emb_dim, dtype=jnp.float32):
    """Deterministic synthetic parameters matching MLP(emb_dim) shapes."""
    k1, k2, k3, k4 = jax.random.split(key, 4)
    hidden = 4 * emb_dim
    scale1 = 1.0 / jnp.sqrt(emb_dim)
    scale2 = 1.0 / jnp.sqrt(hidden)
    w1 = jax.random.uniform(k1, (emb_dim, hidden), dtype, -1.0, 1.0) * scale1
    b1 = jax.random.uniform(k2, (1, hidden), dtype, -1.0, 1.0) * scale1
    w2 = jax.random.uniform(k3, (hidden, emb_dim), dtype, -1.0, 1.0) * scale2
    b2 = jax.random.uniform(k4, (1, emb_dim), dtype, -1.0, 1.0) * scale2
    return w1, b1, w2, b2


def reference_mlp(x, w1, b1, w2, b2):
    h = _gelu_exact(jnp.einsum("btd,dh->bth", x, w1) + b1[0])
    y = _gelu_exact(jnp.einsum("bth,hd->btd", h, w2) + b2[0])
    return y


if __name__ == "__main__":
    # Small shapes implied by the forward pass: tokenizer output [B, T, emb_dim].
    B, T, emb_dim = 2, 8, 32

    key = jax.random.PRNGKey(0)
    kx, kp = jax.random.split(key)

    # Synthetic "tokenizer output" embeddings (RQBottleneckTransformer body is
    # not available; see TODO above).
    x = jax.random.normal(kx, (B, T, emb_dim), dtype=jnp.float32)
    w1, b1, w2, b2 = init_mlp_params(kp, emb_dim)

    ref = reference_mlp(x, w1, b1, w2, b2)

    # f32 parity path: exact erf GELU, f32 weights -> matches PyTorch module.
    params_f32 = prepare_mlp_params(w1, b1, w2, b2, compute_dtype=jnp.float32)
    out = audio_projector_mlp(x, *params_f32, approximate_gelu=False)
    out = jax.block_until_ready(out)
    assert out.shape == (B, T, emb_dim)
    assert jnp.allclose(out, ref, atol=1e-5, rtol=1e-5), "f32 mismatch vs reference"

    # Recommended fast path: bf16 resident weights / matmul inputs, f32
    # accumulation, tanh-approx GELU (EUP).  Looser tolerance.
    params_bf16 = prepare_mlp_params(w1, b1, w2, b2)   # default bf16
    out_bf16 = audio_projector_mlp(x, *params_bf16)
    out_bf16 = jax.block_until_ready(out_bf16)
    assert out_bf16.shape == (B, T, emb_dim)
    assert jnp.allclose(out_bf16, ref, atol=5e-2, rtol=5e-2), "bf16 mismatch vs reference"

    print("KERNEL_OK")
</pallas_src>

<mosaic_0001>
module attributes {stable_mosaic.version = 11 : i64} {
  func.func @_mlp_kernel(%arg0: i32, %arg1: memref<8x128xf32, #tpu.memory_space<vmem>>, %arg2: memref<128x128xf32, #tpu.memory_space<vmem>>, %arg3: memref<1x128xf32, #tpu.memory_space<vmem>>, %arg4: memref<128x128xf32, #tpu.memory_space<vmem>>, %arg5: memref<1x128xf32, #tpu.memory_space<vmem>>, %arg6: memref<8x128xf32, #tpu.memory_space<vmem>>) attributes {dimension_semantics = [#tpu.dimension_semantics<parallel>], iteration_bounds = array<i64: 2>, scalar_prefetch = 0 : i64, scratch_operands = 0 : i64, tpu.core_type = #tpu.core_type<tc>, window_params = [{transform_indices = @transform_0, window_bounds = array<i64: 8, 128>}, {pipeline_mode = #tpu.pipeline_mode<synchronous>, transform_indices = @transform_1, window_bounds = array<i64: 128, 128>}, {pipeline_mode = #tpu.pipeline_mode<synchronous>, transform_indices = @transform_2, window_bounds = array<i64: 1, 128>}, {pipeline_mode = #tpu.pipeline_mode<synchronous>, transform_indices = @transform_3, window_bounds = array<i64: 128, 128>}, {pipeline_mode = #tpu.pipeline_mode<synchronous>, transform_indices = @transform_4, window_bounds = array<i64: 1, 128>}, {transform_indices = @transform_5, window_bounds = array<i64: 8, 128>}]} {
    %c0 = arith.constant 0 : index
    %c0_0 = arith.constant 0 : index
    %0 = vector.load %arg1[%c0, %c0_0] : memref<8x128xf32, #tpu.memory_space<vmem>>, vector<8x128xf32>
    %cst = arith.constant 0.000000e+00 : f32
    %1 = vector.broadcast %cst : f32 to vector<8x128xf32>
    %c0_1 = arith.constant 0 : index
    %c0_2 = arith.constant 0 : index
    %2 = vector.load %arg2[%c0_1, %c0_2] : memref<128x128xf32, #tpu.memory_space<vmem>>, vector<128x128xf32>
    %cst_3 = arith.constant dense<0.000000e+00> : vector<8x128xf32>
    %3 = tpu.matmul %0, %2, %cst_3 {dimension_numbers = #tpu.dot_dimension_numbers<[1], [0], [0], [1], [0, 0, 1, 1], [], []>} : vector<8x128xf32>, vector<128x128xf32>, vector<8x128xf32> -> vector<8x128xf32>
    %c0_4 = arith.constant 0 : index
    %c0_5 = arith.constant 0 : index
    %4 = vector.load %arg3[%c0_4, %c0_5] : memref<1x128xf32, #tpu.memory_space<vmem>>, vector<1x128xf32>
    %5 = vector.broadcast %4 : vector<1x128xf32> to vector<8x128xf32>
    %6 = arith.addf %3, %5 : vector<8x128xf32>
    %cst_6 = arith.constant 5.000000e-01 : f32
    %7 = vector.broadcast %cst_6 : f32 to vector<8x128xf32>
    %8 = arith.mulf %7, %6 : vector<8x128xf32>
    %cst_7 = arith.constant 0.707106769 : f32
    %9 = vector.broadcast %cst_7 : f32 to vector<8x128xf32>
    %10 = arith.mulf %6, %9 : vector<8x128xf32>
    %11 = math.erf %10 : vector<8x128xf32>
    %cst_8 = arith.constant 1.000000e+00 : f32
    %12 = vector.broadcast %cst_8 : f32 to vector<8x128xf32>
    %13 = arith.addf %12, %11 : vector<8x128xf32>
    %14 = arith.mulf %8, %13 : vector<8x128xf32>
    %c0_9 = arith.constant 0 : index
    %c0_10 = arith.constant 0 : index
    %15 = vector.load %arg4[%c0_9, %c0_10] : memref<128x128xf32, #tpu.memory_space<vmem>>, vector<128x128xf32>
    %cst_11 = arith.constant dense<0.000000e+00> : vector<8x128xf32>
    %16 = tpu.matmul %14, %15, %cst_11 {dimension_numbers = #tpu.dot_dimension_numbers<[1], [0], [0], [1], [0, 0, 1, 1], [], []>} : vector<8x128xf32>, vector<128x128xf32>, vector<8x128xf32> -> vector<8x128xf32>
    %17 = arith.addf %1, %16 : vector<8x128xf32>
    %c0_12 = arith.constant 0 : index
    %c0_13 = arith.constant 0 : index
    %18 = vector.load %arg5[%c0_12, %c0_13] : memref<1x128xf32, #tpu.memory_space<vmem>>, vector<1x128xf32>
    %19 = vector.broadcast %18 : vector<1x128xf32> to vector<8x128xf32>
    %20 = arith.addf %17, %19 : vector<8x128xf32>
    %cst_14 = arith.constant 5.000000e-01 : f32
    %21 = vector.broadcast %cst_14 : f32 to vector<8x128xf32>
    %22 = arith.mulf %21, %20 : vector<8x128xf32>
    %cst_15 = arith.constant 0.707106769 : f32
    %23 = vector.broadcast %cst_15 : f32 to vector<8x128xf32>
    %24 = arith.mulf %20, %23 : vector<8x128xf32>
    %25 = math.erf %24 : vector<8x128xf32>
    %cst_16 = arith.constant 1.000000e+00 : f32
    %26 = vector.broadcast %cst_16 : f32 to vector<8x128xf32>
    %27 = arith.addf %26, %25 : vector<8x128xf32>
    %28 = arith.mulf %22, %27 : vector<8x128xf32>
    %c0_17 = arith.constant 0 : index
    %c0_18 = arith.constant 0 : index
    %29 = vector.load %arg6[%c0_17, %c0_18] : memref<8x128xf32, #tpu.memory_space<vmem>>, vector<8x128xf32>
    tpu.vector_store %arg6[%c0_17, %c0_18], %28 {strides = array<i32>} : memref<8x128xf32, #tpu.memory_space<vmem>>, vector<8x128xf32>,
    return
  }
  func.func @transform_0(%arg0: i32) -> (i32, i32) {
    %c0_i32 = arith.constant 0 : i32
    %c0_i32_0 = arith.constant 0 : i32
    return %arg0, %c0_i32 : i32, i32
  }
  func.func @transform_1(%arg0: i32) -> (i32, i32) {
    %c0_i32 = arith.constant 0 : i32
    %c0_i32_0 = arith.constant 0 : i32
    %c0_i32_1 = arith.constant 0 : i32
    return %c0_i32, %c0_i32_0 : i32, i32
  }
  func.func @transform_2(%arg0: i32) -> (i32, i32) {
    %c0_i32 = arith.constant 0 : i32
    %c0_i32_0 = arith.constant 0 : i32
    %c0_i32_1 = arith.constant 0 : i32
    return %c0_i32, %c0_i32_0 : i32, i32
  }
  func.func @transform_3(%arg0: i32) -> (i32, i32) {
    %c0_i32 = arith.constant 0 : i32
    %c0_i32_0 = arith.constant 0 : i32
    %c0_i32_1 = arith.constant 0 : i32
    return %c0_i32, %c0_i32_0 : i32, i32
  }
  func.func @transform_4(%arg0: i32) -> (i32, i32) {
    %c0_i32 = arith.constant 0 : i32
    %c0_i32_0 = arith.constant 0 : i32
    %c0_i32_1 = arith.constant 0 : i32
    return %c0_i32, %c0_i32_0 : i32, i32
  }
  func.func @transform_5(%arg0: i32) -> (i32, i32) {
    %c0_i32 = arith.constant 0 : i32
    %c0_i32_0 = arith.constant 0 : i32
    return %arg0, %c0_i32 : i32, i32
  }
}

</mosaic_0001>

<bundles_post_ra>
// kernel: audio_projector_mlp.1
= control target key start
LH: loop header
LB: loop body
LE: loop exit
PB: predicated region body
PF: predicated region fallthrough
CT: control target
= control target key end

     0   :  { %10 = vsyncpa [#allocation3], 0  ;;  %s959_s0 = inlined_call_operand.vmem [shape: f32[16,128], index: 0, kind: input, shape index: {}]   ;;  %s960_s1 = inlined_call_operand.hbm [shape: f32[128,128], index: 1, kind: input, shape index: {}]   ;;  %s961_s2 = inlined_call_operand.vmem [shape: f32[1,128], index: 2, kind: input, shape index: {}]   ;;  %s962_s3 = inlined_call_operand.hbm [shape: f32[128,128], index: 3, kind: input, shape index: {}]   ;;  %s963_s4 = inlined_call_operand.vmem [shape: f32[1,128], index: 4, kind: input, shape index: {}]   ;;  %s964_s5 = inlined_call_operand.vmem [shape: f32[16,128], index: 5, kind: output, shape index: {}]  }
   0x1   :  { %11 = vsyncpa [#allocation5], 0  ;;  %s837_s18 = smov 0  }
   0x2 LB: > { %s843_s19 = sadd.s32 4294967295, %s798_s18   ;;  %p525_p0 = scmp.ge.s32.totalorder %s798_s18, 1  ;;  %s798_s18 = sphi %s837_s18, %s17_s18  }
   0x3   : > { %p158_p1 = scmp.lt.s32.totalorder %s798_s18, 3  ;;  %s800_s20 = smov [#allocation2]  }
   0x4   : > { %s170_s21 = sshll.u32 %s800_s20, 4  ;;  %p965_p3 = scmp.eq.s32.totalorder %s843_s19, 0  ;;  %s171_s21 = int_to_ptr.vmem [resolvable:$true] %s170_s21 }
   0x5   : > { %p847_p2 = pnand %p525_p0, %p158_p1  ;;  %s801_s23 = smov [#allocation4]  }
   0x6   : > { %s186_s24 = sshll.u32 %s801_s23, 4  ;;  %s728_s28 = scalar_lea.hbm %s960_s1, 2048  ;;  %s860_s24 = int_to_ptr.vmem [resolvable:$true] %s186_s24 }
   0x7   : > { %s967_s22 = scalar_select %p847_p2, 1, 0 }
   0x8   : > { %p698_p4 = pneg %p847_p2  ;;  %p729_p6 = scmp.ne.s32.totalorder %s960_s1, %s728_s28 }
   0x9   : > { %p735_p10 = scmp.lt.u32.totalorder %s728_s28, %s960_s1 }
   0xa   : > { %p856_p5 = pnand %p965_p3, %p698_p4 }
   0xc   : > { %p730_p7 = pneg %p856_p5 }
   0xe   : > { %p731_p8 = pnand %p730_p7, %p729_p6 }
  0x10   : > { %p732_p9 = pneg %p731_p8 }
  0x12   : > { %p737_p11 = pnand %p735_p10, %p732_p9 }
  0x14   : > { %740 = shalt.err (!%p737_p11)
}
  0x15   : > { %s741_s8 = scalar_lea.vmem %s171_s21, 2048  ;;  %p749_p1 = scmp.lt.s32.totalorder %s171_s21, %s171_s21 }
  0x16   : > { %p742_p12 = scmp.ne.s32.totalorder %s171_s21, %s741_s8  ;;  %p750_p4 = scmp.lt.s32.totalorder %s741_s8, %s741_s8 }
  0x18   : > { %p744_p13 = pnand %p742_p12, %p730_p7  ;;  %p751_p3 = por %p750_p4, %p749_p1 }
  0x1a   : > { %p745_p0 = pneg %p744_p13 }
  0x1c   : > { %p752_p2 = pnand %p751_p3, %p745_p0 }
  0x1e   : > { %755 = shalt.err (!%p752_p2)
}
  0x1f   : > { %s802_s9 = smov 128   ;;  %s803_s10 = smov 8  }
  0x20   : > { %701 = dma.hbm_to_vmem [thread:$0]  (!%p856_p5), %s960_s1, 2048, %s171_s21, [#allocation3], %s802_s9, %s802_s9, %s803_s10  }
  0x21   : > { %s756_s15 = scalar_lea.hbm %s962_s3, 2048 }
  0x22   : > { %p757_p6 = scmp.ne.s32.totalorder %s962_s3, %s756_s15  ;;  %p763_p8 = scmp.lt.u32.totalorder %s756_s15, %s962_s3 }
  0x24   : > { %p759_p2 = pnand %p757_p6, %p730_p7 }
  0x26   : > { %p760_p3 = pneg %p759_p2 }
  0x28   : > { %p765_p9 = pnand %p763_p8, %p760_p3 }
  0x2a   : > { %768 = shalt.err (!%p765_p9)
}
  0x2b   : > { %s769_s21 = scalar_lea.vmem %s860_s24, 2048  ;;  %p777_p13 = scmp.lt.s32.totalorder %s860_s24, %s860_s24 }
  0x2c   : > { %p770_p10 = scmp.ne.s32.totalorder %s860_s24, %s769_s21  ;;  %p778_p0 = scmp.lt.s32.totalorder %s769_s21, %s769_s21 }
  0x2e   : > { %p772_p11 = pnand %p770_p10, %p730_p7  ;;  %p779_p1 = por %p778_p0, %p777_p13 }
  0x30   : > { %p773_p12 = pneg %p772_p11 }
  0x32   : > { %p780_p4 = pnand %p779_p1, %p773_p12 }
  0x34   : > { %783 = shalt.err (!%p780_p4)
}
  0x35   : > { %704 = dma.hbm_to_vmem [thread:$0]  (!%p856_p5), %s962_s3, 2048, %s860_s24, [#allocation5], %s802_s9, %s802_s9, %s803_s10  }
  0x36   : > { %p969_p6 = scmp.ne.s32.totalorder %s967_s22, 0 }
  0x37   : > { %p970_p2 = scmp.eq.s32.totalorder (!%p969_p6), %s843_s19, 0 }
  0x38   : > { %212 = sbr.rel (%p969_p6) target bundleno = 564 (0x234), region = 40 }
  0x3f   : > { %789 = dma.done.wait (%p970_p2), [#allocation3], 2048   ;;  %p971_p7 = pmov %p970_p2 }
  0x40   : > { %p972_p3 = pmov %p970_p2 }
  0x41   : > { %791 = vsyncadd (%p971_p7), [#allocation3], 4294965248 }
  0x42   : > { %793 = dma.done.wait (%p972_p3), [#allocation5], 2048   ;;  %p973_p8 = pmov %p970_p2 }
  0x43   : > { %v804_v0 = vmov 0.0|0.0   ;;  %vm805_vm0 = vmmov 0   ;;  %v806_v1 = vmov 0.0   ;;  %v251_v2 = vld [vmem:[#allocation2] sm:$0xff]  ;;  %v252_v3 = vld [vmem:[#allocation2 + $0x8] sm:$0xff]  ;;  %v253_v4 = vld [vmem:[#allocation2 + $0x10] sm:$0xff] }
  0x44   : > { %795 = vsyncadd (%p973_p8), [#allocation5], 4294965248  ;;  %642 = vmatprep.subr.bf16.mxu0 %v804_v0  ;;  %604 = vmatprep.mubr.msk.f32.mxu0 %vm805_vm0, %v806_v1  ;;  %v643_v5 = vpack.c.bf16 %v252_v3, %v251_v2  ;;  %v254_v6 = vld [vmem:[#allocation2 + $0x18] sm:$0xff]  ;;  %v255_v8 = vld [vmem:[#allocation2 + $0x20] sm:$0xff]  ;;  %p242_p5 = scmp.lt.s32.totalorder %s843_s19, 1 }
  0x45   : > { %666 = vmatprep.subr.bf16.mxu1 %v804_v0  ;;  %639 = vmatprep.mubr.msk.f32.mxu1 %vm805_vm0, %v806_v1  ;;  %v646_v7 = vpack.c.bf16 %v254_v6, %v253_v4  ;;  %v256_v9 = vld [vmem:[#allocation2 + $0x28] sm:$0xff]  ;;  %v349_v10 = vld [vmem:[#allocation4] sm:$0xff]  ;;  %v351_v12 = vld [vmem:[#allocation4 + $0x10] sm:$0xff] }
  0x46   : > { %644 = vmatpush3.bf16.msra.mxu0 %v643_v5  ;;  %v350_v11 = vld [vmem:[#allocation4 + $0x8] sm:$0xff]  ;;  %v352_v13 = vld [vmem:[#allocation4 + $0x18] sm:$0xff]  ;;  %v649_v14 = vpack.c.bf16 %v256_v9, %v255_v8  ;;  %v257_v16 = vld [vmem:[#allocation2 + $0x30] sm:$0xff]  ;;  %s975_s19 = smov (!%p242_p5, %s843_s19), 1 }
  0x47   : > { %645 = vmatprep.subr.bf16.mxu0 %v804_v0  ;;  %v667_v15 = vpack.c.bf16 %v350_v11, %v349_v10  ;;  %v258_v17 = vld [vmem:[#allocation2 + $0x38] sm:$0xff]  ;;  %v670_v18 = vpack.c.bf16 %v352_v13, %v351_v12  ;;  %v353_v19 = vld [vmem:[#allocation4 + $0x20] sm:$0xff]  ;;  %v354_v20 = vld [vmem:[#allocation4 + $0x28] sm:$0xff]  ;;  %s532_s22 = sshll.u32 %s975_s19, 3 }
  0x48   : > { %v652_v21 = vpack.c.bf16 %v258_v17, %v257_v16  ;;  %v259_v22 = vld [vmem:[#allocation2 + $0x40] sm:$0xff]  ;;  %v260_v23 = vld [vmem:[#allocation2 + $0x48] sm:$0xff]  ;;  %v673_v24 = vpack.c.bf16 %v354_v20, %v353_v19  ;;  %v261_v26 = vld [vmem:[#allocation2 + $0x50] sm:$0xff]  ;;  %s245_s28 = scalar_lea.vmem %s959_s0, %s532_s22  ;;  %s249_s10 = scalar_lea.vmem %s964_s5, %s532_s22 }
  0x49   : > { %668 = vmatpush3.bf16.msra.mxu1 %v667_v15  ;;  %v655_v25 = vpack.c.bf16 %v260_v23, %v259_v22  ;;  %v262_v27 = vld [vmem:[#allocation2 + $0x58] sm:$0xff]  ;;  %v263_v29 = vld [vmem:[#allocation2 + $0x60] sm:$0xff]  ;;  %v264_v30 = vld [vmem:[#allocation2 + $0x68] sm:$0xff] }
  0x4a   : > { %647 = vmatpush3.bf16.msra.mxu0 %v646_v7  ;;  %669 = vmatprep.subr.bf16.mxu1 %v804_v0  ;;  %v658_v28 = vpack.c.bf16 %v262_v27, %v261_v26  ;;  %v661_v31 = vpack.c.bf16 %v264_v30, %v263_v29  ;;  %v265_v32 = vld [vmem:[#allocation2 + $0x70] sm:$0xff]  ;;  %v266_v33 = vld [vmem:[#allocation2 + $0x78] sm:$0xff]  ;;  %v250_v35 = vld [vmem:[%s245_s28] sm:$0xff] }
  0x4b   : > { %648 = vmatprep.subr.bf16.mxu0 %v804_v0  ;;  %v664_v34 = vpack.c.bf16 %v266_v33, %v265_v32  ;;  %v355_v36 = vld [vmem:[#allocation4 + $0x30] sm:$0xff]  ;;  %v356_v37 = vld [vmem:[#allocation4 + $0x38] sm:$0xff]  ;;  %v357_v39 = vld [vmem:[#allocation4 + $0x40] sm:$0xff] }
  0x4c   : > { %v676_v38 = vpack.c.bf16 %v356_v37, %v355_v36  ;;  %v358_v40 = vld [vmem:[#allocation4 + $0x48] sm:$0xff]  ;;  %v359_v42 = vld [vmem:[#allocation4 + $0x50] sm:$0xff]  ;;  %v360_v43 = vld [vmem:[#allocation4 + $0x58] sm:$0xff] }
  0x4d   : > { %671 = vmatpush3.bf16.msra.mxu1 %v670_v18  ;;  %v679_v41 = vpack.c.bf16 %v358_v40, %v357_v39  ;;  %v682_v44 = vpack.c.bf16 %v360_v43, %v359_v42  ;;  %v361_v45 = vld [vmem:[#allocation4 + $0x60] sm:$0xff]  ;;  %v362_v46 = vld [vmem:[#allocation4 + $0x68] sm:$0xff]  ;;  %v363_v48 = vld [vmem:[#allocation4 + $0x70] sm:$0xff] }
  0x4e   : > { %650 = vmatpush3.bf16.msra.mxu0 %v649_v14  ;;  %672 = vmatprep.subr.bf16.mxu1 %v804_v0  ;;  %v685_v47 = vpack.c.bf16 %v362_v46, %v361_v45  ;;  %v364_v49 = vld [vmem:[#allocation4 + $0x78] sm:$0xff]  ;;  %v534_v51 = vld [vmem:[%s961_s2] ss:$0 sm:$0xff] }
  0x4f   : > { %651 = vmatprep.subr.bf16.mxu0 %v804_v0  ;;  %v688_v50 = vpack.c.bf16 %v364_v49, %v363_v48  ;;  %v535_v60 = vld [vmem:[%s963_s4] ss:$0 sm:$0xff] }
  0x51   : > { %674 = vmatpush3.bf16.msra.mxu1 %v673_v24 }
  0x52   : > { %653 = vmatpush3.bf16.msra.mxu0 %v652_v21  ;;  %675 = vmatprep.subr.bf16.mxu1 %v804_v0 }
  0x53   : > { %654 = vmatprep.subr.bf16.mxu0 %v804_v0 }
  0x55   : > { %677 = vmatpush3.bf16.msra.mxu1 %v676_v38 }
  0x56   : > { %656 = vmatpush3.bf16.msra.mxu0 %v655_v25  ;;  %678 = vmatprep.subr.bf16.mxu1 %v804_v0 }
  0x57   : > { %657 = vmatprep.subr.bf16.mxu0 %v804_v0 }
  0x59   : > { %680 = vmatpush3.bf16.msra.mxu1 %v679_v41 }
  0x5a   : > { %659 = vmatpush3.bf16.msra.mxu0 %v658_v28  ;;  %681 = vmatprep.subr.bf16.mxu1 %v804_v0 }
  0x5b   : > { %660 = vmatprep.subr.bf16.mxu0 %v804_v0 }
  0x5d   : > { %683 = vmatpush3.bf16.msra.mxu1 %v682_v44 }
  0x5e   : > { %662 = vmatpush3.bf16.msra.mxu0 %v661_v31  ;;  %684 = vmatprep.subr.bf16.mxu1 %v804_v0 }
  0x5f   : > { %663 = vmatprep.subr.bf16.mxu0 %v804_v0 }
  0x61   : > { %686 = vmatpush3.bf16.msra.mxu1 %v685_v47 }
  0x62   : > { %665 = vmatpush3.bf16.msra.mxu0 %v664_v34  ;;  %687 = vmatprep.subr.bf16.mxu1 %v804_v0 }
  0x65   : > { %605 = vmatmul.mubr.f32.vlgmr.msra.gmra.mrb[0].mxu0 %v250_v35  ;;  %689 = vmatpush3.bf16.msra.mxu1 %v688_v50 }
 0x138   : > { %v340_v52 = vpop.f32.mrb[0].mxu0 }
 0x139   : > { %v341_v53 = vadd.f32 %v534_v51, %v340_v52  ;;  %v606_v54 = vpop.f32.mrb[1].mxu0 }
 0x13b   : > { %v345_v55 = vmul.f32 0.70710677, %v341_v53  ;;  %v344_v57 = vmul.f32 0.5, %v341_v53 }
 0x13d   : > { %724 = verf.f32 %v345_v55 }
 0x147   : > { %v725_v56 = vpop.eup %724 }
 0x148   : > { %v347_v58 = vadd.f32 1.0, %v725_v56 }
 0x14a   : > { %v348_v59 = vmul.f32 %v347_v58, %v344_v57 }
 0x14c   : > { %640 = vmatmul.mubr.f32.vlgmr.msra.gmra.mrb[0].mxu1 %v348_v59 }
 0x21f   : > { %v438_v61 = vpop.f32.mrb[0].mxu1 }
 0x220   : > { %v439_v62 = vadd.f32 %v535_v60, %v438_v61  ;;  %v641_v63 = vpop.f32.mrb[1].mxu1 }
 0x222   : > { %v443_v0 = vmul.f32 0.70710677, %v439_v62  ;;  %v442_v2 = vmul.f32 0.5, %v439_v62 }
 0x224   : > { %726 = verf.f32 %v443_v0 }
 0x22e   : > { %v727_v1 = vpop.eup %726 }
 0x22f   : > { %v445_v3 = vadd.f32 1.0, %v727_v1 }
 0x231   : > { %v446_v4 = vmul.f32 %v445_v3, %v442_v2 }
 0x233   : > { %447 = vst [vmem:[%s249_s10] sm:$0xff] %v446_v4 }
 0x234 PF: > { %s17_s18 = sadd.s32 1, %s798_s18  }
 0x235   : > { %p14_p9 = scmp.ge.s32.totalorder %s17_s18, 4  }
 0x237   :  { %16 = sbr.rel (!%p14_p9) target bundleno = 2 (0x2), region = 79 }
 0x23e   :  { %467 = vsyncpa [#allocation3], 1 }
 0x23f   :  { %469 = vsyncpa [#allocation3 + $0x1], 1 }
 0x240   :  { %470 = vsyncpa [#allocation5], 1 }

</bundles_post_ra>
